<compile_context>
chip_gen: v7x
topology: tpu7x:2x2x1
jax: 0.10.0
libtpu: 0.0.40
codegen_flags: <defaults>
</compile_context>

<pallas_src>
import functools

import jax
import jax.numpy as jnp
from jax.experimental import pallas as pl
from jax.experimental.pallas import tpu as pltpu

IN_FEATS = 6 * 7        # 42
IN_PAD = 64             # layer-1 contraction dim (42 zero-padded to 64)
H1 = 256
H2 = 128
OUT_FEATS = 7
OUT_PAD = 8             # narrow f32 output; block == full last dim (legal)


def _round_up(n, m):
    return ((n + m - 1) // m) * m


def _dqn_kernel(x_ref, w1_ref, b1_ref, w2_ref, b2_ref, w3_ref, b3_ref, o_ref):
    x = x_ref[...]                                                      # (TB, 64) bf16
    h1 = jnp.dot(x, w1_ref[...], preferred_element_type=jnp.float32)    # (TB, 256) f32
    h1 = jnp.maximum(h1 + b1_ref[...], 0.0).astype(jnp.bfloat16)
    h2 = jnp.dot(h1, w2_ref[...], preferred_element_type=jnp.float32)   # (TB, 128) f32
    h2 = jnp.maximum(h2 + b2_ref[...], 0.0).astype(jnp.bfloat16)
    out = jnp.dot(h2, w3_ref[...], preferred_element_type=jnp.float32) + b3_ref[...]
    o_ref[...] = out.astype(o_ref.dtype)                                # (TB, 8) f32


def _choose_tile_b(batch, tile_b):
    """Batch tile: one small tile for tiny batches; otherwise balanced tiles
    capped at tile_b, keeping >= 2 tiles so v7x megacore can use both TCs."""
    bm = _round_up(max(batch, 1), 8)
    if bm <= 512:
        return bm
    n_tiles = max(2, pl.cdiv(bm, tile_b))
    return _round_up(pl.cdiv(bm, n_tiles), 8)


def dqn_forward(x, params, *, tile_b=2048):
    """x: (B, 6, 7) or (B, 42) board tensor. Returns (B, 7) float32 Q-values."""
    w1, b1, w2, b2, w3, b3 = params  # pre-padded: bf16 weights, f32 biases

    x2 = x.reshape(-1, IN_FEATS)
    if x2.dtype != jnp.bfloat16:
        x2 = x2.astype(jnp.bfloat16)     # {-1, 0, 1} boards are exact in bf16
    B = x2.shape[0]

    TB = _choose_tile_b(B, tile_b)
    Bp = _round_up(B, TB)
    n_tiles = Bp // TB

    # Single fused pad: batch rows -> Bp, features 42 -> 64 lanes (zeros, exact).
    xp = jnp.pad(x2, ((0, Bp - B), (0, IN_PAD - IN_FEATS)))

    def const_spec(shape):
        return pl.BlockSpec(shape, lambda i: (0, 0))

    flops = 2 * Bp * (IN_PAD * H1 + H1 * H2 + H2 * OUT_PAD)
    weight_bytes = 2 * (IN_PAD * H1 + H1 * H2 + H2 * OUT_PAD)
    bias_bytes = 4 * (H1 + H2 + OUT_PAD)
    bytes_accessed = (weight_bytes + bias_bytes
                      + Bp * IN_PAD * 2        # bf16 activations in
                      + Bp * OUT_PAD * 4)      # narrow f32 Q-values out

    out = pl.pallas_call(
        _dqn_kernel,
        out_shape=jax.ShapeDtypeStruct((Bp, OUT_PAD), jnp.float32),
        grid=(n_tiles,),
        in_specs=[
            pl.BlockSpec((TB, IN_PAD), lambda i: (i, 0)),   # x streams per tile
            const_spec((IN_PAD, H1)),                       # w1 VMEM-resident
            const_spec((1, H1)),                            # b1
            const_spec((H1, H2)),                           # w2
            const_spec((1, H2)),                            # b2
            const_spec((H2, OUT_PAD)),                      # w3
            const_spec((1, OUT_PAD)),                       # b3
        ],
        out_specs=pl.BlockSpec((TB, OUT_PAD), lambda i: (i, 0)),
        compiler_params=pltpu.CompilerParams(
            dimension_semantics=("parallel",),
            vmem_limit_bytes=32 * 1024 * 1024,
        ),
        cost_estimate=pl.CostEstimate(
            flops=flops, transcendentals=0, bytes_accessed=bytes_accessed
        ),
    )(xp, w1, b1, w2, b2, w3, b3)

    return out[:B, :OUT_FEATS]


def init_params(key):
    """PyTorch-Linear-style init; weights stored transposed, zero-padded, bf16."""
    def linear(k, fan_in, fan_out, pad_in, pad_out):
        kw, kb = jax.random.split(k)
        bound = 1.0 / float(fan_in) ** 0.5
        w = jax.random.uniform(kw, (fan_in, fan_out), jnp.float32, -bound, bound)
        b = jax.random.uniform(kb, (1, fan_out), jnp.float32, -bound, bound)
        wp = jnp.zeros((pad_in, pad_out), jnp.float32).at[:fan_in, :fan_out].set(w)
        bp = jnp.zeros((1, pad_out), jnp.float32).at[:, :fan_out].set(b)
        return wp.astype(jnp.bfloat16), bp

    k1, k2, k3 = jax.random.split(key, 3)
    w1, b1 = linear(k1, IN_FEATS, H1, IN_PAD, H1)
    w2, b2 = linear(k2, H1, H2, H1, H2)
    w3, b3 = linear(k3, H2, OUT_FEATS, H2, OUT_PAD)
    return (w1, b1, w2, b2, w3, b3)


def _reference_forward(x, params):
    """Pure-jnp reference mirroring the kernel's dtype path (bf16 w, f32 acc)."""
    w1, b1, w2, b2, w3, b3 = params
    x2 = x.reshape(-1, IN_FEATS).astype(jnp.float32)
    h1 = jax.nn.relu(x2 @ w1[:IN_FEATS, :].astype(jnp.float32) + b1)
    h1 = h1.astype(jnp.bfloat16).astype(jnp.float32)
    h2 = jax.nn.relu(h1 @ w2.astype(jnp.float32) + b2)
    h2 = h2.astype(jnp.bfloat16).astype(jnp.float32)
    return (h2 @ w3.astype(jnp.float32) + b3)[:, :OUT_FEATS]


if __name__ == "__main__":
    key = jax.random.PRNGKey(0)
    kx, kp = jax.random.split(key)

    batch = 2
    # Connect-4 board: 6 rows x 7 columns, values in {-1, 0, 1}.
    x = jax.random.randint(kx, (batch, 6, 7), -1, 2).astype(jnp.float32)
    params = init_params(kp)

    fwd = jax.jit(functools.partial(dqn_forward, params=params))
    out = jax.block_until_ready(fwd(x))

    ref = _reference_forward(x, params)
    assert out.shape == (batch, OUT_FEATS)
    assert jnp.allclose(out, ref, atol=1e-2, rtol=1e-2), (
        f"max abs err {jnp.max(jnp.abs(out - ref))}"
    )

    print("KERNEL_OK")
</pallas_src>

<mosaic_0001>
module attributes {stable_mosaic.version = 11 : i64} {
  func.func @_dqn_kernel(%arg0: i32, %arg1: memref<8x64xbf16, #tpu.memory_space<vmem>>, %arg2: memref<64x256xbf16, #tpu.memory_space<vmem>>, %arg3: memref<1x256xf32, #tpu.memory_space<vmem>>, %arg4: memref<256x128xbf16, #tpu.memory_space<vmem>>, %arg5: memref<1x128xf32, #tpu.memory_space<vmem>>, %arg6: memref<128x8xbf16, #tpu.memory_space<vmem>>, %arg7: memref<1x8xf32, #tpu.memory_space<vmem>>, %arg8: memref<8x8xf32, #tpu.memory_space<vmem>>) attributes {dimension_semantics = [#tpu.dimension_semantics<parallel>], iteration_bounds = array<i64: 1>, scalar_prefetch = 0 : i64, scratch_operands = 0 : i64, tpu.core_type = #tpu.core_type<tc>, window_params = [{transform_indices = @transform_0, window_bounds = array<i64: 8, 64>}, {pipeline_mode = #tpu.pipeline_mode<synchronous>, transform_indices = @transform_1, window_bounds = array<i64: 64, 256>}, {pipeline_mode = #tpu.pipeline_mode<synchronous>, transform_indices = @transform_2, window_bounds = array<i64: 1, 256>}, {pipeline_mode = #tpu.pipeline_mode<synchronous>, transform_indices = @transform_3, window_bounds = array<i64: 256, 128>}, {pipeline_mode = #tpu.pipeline_mode<synchronous>, transform_indices = @transform_4, window_bounds = array<i64: 1, 128>}, {pipeline_mode = #tpu.pipeline_mode<synchronous>, transform_indices = @transform_5, window_bounds = array<i64: 128, 8>}, {pipeline_mode = #tpu.pipeline_mode<synchronous>, transform_indices = @transform_6, window_bounds = array<i64: 1, 8>}, {transform_indices = @transform_7, window_bounds = array<i64: 8, 8>}]} {
    %c0 = arith.constant 0 : index
    %c0_0 = arith.constant 0 : index
    %0 = vector.load %arg1[%c0, %c0_0] : memref<8x64xbf16, #tpu.memory_space<vmem>>, vector<8x64xbf16>
    %c0_1 = arith.constant 0 : index
    %c0_2 = arith.constant 0 : index
    %1 = vector.load %arg2[%c0_1, %c0_2] : memref<64x256xbf16, #tpu.memory_space<vmem>>, vector<64x256xbf16>
    %cst = arith.constant dense<0.000000e+00> : vector<8x256xf32>
    %2 = tpu.matmul %0, %1, %cst {dimension_numbers = #tpu.dot_dimension_numbers<[1], [0], [0], [1], [0, 0, 1, 1], [], []>} : vector<8x64xbf16>, vector<64x256xbf16>, vector<8x256xf32> -> vector<8x256xf32>
    %c0_3 = arith.constant 0 : index
    %c0_4 = arith.constant 0 : index
    %3 = vector.load %arg3[%c0_3, %c0_4] : memref<1x256xf32, #tpu.memory_space<vmem>>, vector<1x256xf32>
    %4 = vector.broadcast %3 : vector<1x256xf32> to vector<8x256xf32>
    %5 = arith.addf %2, %4 : vector<8x256xf32>
    %cst_5 = arith.constant 0.000000e+00 : f32
    %6 = vector.broadcast %cst_5 : f32 to vector<8x256xf32>
    %7 = arith.maximumf %5, %6 : vector<8x256xf32>
    %8 = arith.truncf %7 : vector<8x256xf32> to vector<8x256xbf16>
    %c0_6 = arith.constant 0 : index
    %c0_7 = arith.constant 0 : index
    %9 = vector.load %arg4[%c0_6, %c0_7] : memref<256x128xbf16, #tpu.memory_space<vmem>>, vector<256x128xbf16>
    %cst_8 = arith.constant dense<0.000000e+00> : vector<8x128xf32>
    %10 = tpu.matmul %8, %9, %cst_8 {dimension_numbers = #tpu.dot_dimension_numbers<[1], [0], [0], [1], [0, 0, 1, 1], [], []>} : vector<8x256xbf16>, vector<256x128xbf16>, vector<8x128xf32> -> vector<8x128xf32>
    %c0_9 = arith.constant 0 : index
    %c0_10 = arith.constant 0 : index
    %11 = vector.load %arg5[%c0_9, %c0_10] : memref<1x128xf32, #tpu.memory_space<vmem>>, vector<1x128xf32>
    %12 = vector.broadcast %11 : vector<1x128xf32> to vector<8x128xf32>
    %13 = arith.addf %10, %12 : vector<8x128xf32>
    %cst_11 = arith.constant 0.000000e+00 : f32
    %14 = vector.broadcast %cst_11 : f32 to vector<8x128xf32>
    %15 = arith.maximumf %13, %14 : vector<8x128xf32>
    %16 = arith.truncf %15 : vector<8x128xf32> to vector<8x128xbf16>
    %c0_12 = arith.constant 0 : index
    %c0_13 = arith.constant 0 : index
    %17 = vector.load %arg6[%c0_12, %c0_13] : memref<128x8xbf16, #tpu.memory_space<vmem>>, vector<128x8xbf16>
    %cst_14 = arith.constant dense<0.000000e+00> : vector<8x8xf32>
    %18 = tpu.matmul %16, %17, %cst_14 {dimension_numbers = #tpu.dot_dimension_numbers<[1], [0], [0], [1], [0, 0, 1, 1], [], []>} : vector<8x128xbf16>, vector<128x8xbf16>, vector<8x8xf32> -> vector<8x8xf32>
    %c0_15 = arith.constant 0 : index
    %c0_16 = arith.constant 0 : index
    %19 = vector.load %arg7[%c0_15, %c0_16] : memref<1x8xf32, #tpu.memory_space<vmem>>, vector<1x8xf32>
    %20 = vector.broadcast %19 : vector<1x8xf32> to vector<8x8xf32>
    %21 = arith.addf %18, %20 : vector<8x8xf32>
    %c0_17 = arith.constant 0 : index
    %c0_18 = arith.constant 0 : index
    %22 = vector.load %arg8[%c0_17, %c0_18] : memref<8x8xf32, #tpu.memory_space<vmem>>, vector<8x8xf32>
    tpu.vector_store %arg8[%c0_17, %c0_18], %21 {strides = array<i32>} : memref<8x8xf32, #tpu.memory_space<vmem>>, vector<8x8xf32>,
    return
  }
  func.func @transform_0(%arg0: i32) -> (i32, i32) {
    %c0_i32 = arith.constant 0 : i32
    %c0_i32_0 = arith.constant 0 : i32
    return %arg0, %c0_i32 : i32, i32
  }
  func.func @transform_1(%arg0: i32) -> (i32, i32) {
    %c0_i32 = arith.constant 0 : i32
    %c0_i32_0 = arith.constant 0 : i32
    %c0_i32_1 = arith.constant 0 : i32
    return %c0_i32, %c0_i32_0 : i32, i32
  }
  func.func @transform_2(%arg0: i32) -> (i32, i32) {
    %c0_i32 = arith.constant 0 : i32
    %c0_i32_0 = arith.constant 0 : i32
    %c0_i32_1 = arith.constant 0 : i32
    return %c0_i32, %c0_i32_0 : i32, i32
  }
  func.func @transform_3(%arg0: i32) -> (i32, i32) {
    %c0_i32 = arith.constant 0 : i32
    %c0_i32_0 = arith.constant 0 : i32
    %c0_i32_1 = arith.constant 0 : i32
    return %c0_i32, %c0_i32_0 : i32, i32
  }
  func.func @transform_4(%arg0: i32) -> (i32, i32) {
    %c0_i32 = arith.constant 0 : i32
    %c0_i32_0 = arith.constant 0 : i32
    %c0_i32_1 = arith.constant 0 : i32
    return %c0_i32, %c0_i32_0 : i32, i32
  }
  func.func @transform_5(%arg0: i32) -> (i32, i32) {
    %c0_i32 = arith.constant 0 : i32
    %c0_i32_0 = arith.constant 0 : i32
    %c0_i32_1 = arith.constant 0 : i32
    return %c0_i32, %c0_i32_0 : i32, i32
  }
  func.func @transform_6(%arg0: i32) -> (i32, i32) {
    %c0_i32 = arith.constant 0 : i32
    %c0_i32_0 = arith.constant 0 : i32
    %c0_i32_1 = arith.constant 0 : i32
    return %c0_i32, %c0_i32_0 : i32, i32
  }
  func.func @transform_7(%arg0: i32) -> (i32, i32) {
    %c0_i32 = arith.constant 0 : i32
    %c0_i32_0 = arith.constant 0 : i32
    return %arg0, %c0_i32 : i32, i32
  }
}

</mosaic_0001>

<bundles_post_ra>
// kernel: dqn_forward.1
= control target key start
LH: loop header
LB: loop body
LE: loop exit
PB: predicated region body
PF: predicated region fallthrough
CT: control target
= control target key end

     0   :  { %v556_v1 = vmov 0   ;;  %vm88_vm0 = vcmask 523264   ;;  %v557_v26 = vmov 0.0   ;;  %v38_v33 = vlaneseq  ;;  %s710_s1 = inlined_call_operand.vmem [shape: bf16[64,256], index: 1, kind: input, shape index: {}]   ;;  %s711_s3 = inlined_call_operand.vmem [shape: bf16[256,128], index: 3, kind: input, shape index: {}]   ;;  %s712_s0 = inlined_call_operand.vmem [shape: bf16[8,64], index: 0, kind: input, shape index: {}]   ;;  %s713_s5 = inlined_call_operand.vmem [shape: bf16[128,8], index: 5, kind: input, shape index: {}]   ;;  %s714_s2 = inlined_call_operand.vmem [shape: f32[1,256], index: 2, kind: input, shape index: {}]   ;;  %s715_s4 = inlined_call_operand.vmem [shape: f32[1,128], index: 4, kind: input, shape index: {}]   ;;  %s716_s6 = inlined_call_operand.vmem [shape: f32[1,8], index: 6, kind: input, shape index: {}]   ;;  %s717_s7 = inlined_call_operand.vmem [shape: f32[8,8], index: 7, kind: output, shape index: {}]  }
   0x1   :  { %v520_v0 = vld [vmem:[%s710_s1 + $0x4] ss:$8 sps:$4 sm:$0xff]   ;;  %124 = vmatprep.mubr.bf16.mxu0 %v556_v1  ;;  %v522_v2 = vld [vmem:[%s710_s1] ss:$8 sps:$4 sm:$0xff]   ;;  %v523_v3 = vld [vmem:[%s710_s1 + $0x14] ss:$8 sps:$4 sm:$0xff]  }
   0x2   :  { %92 = vmatprep.subr.bf16.mxu0 %v520_v0  ;;  %v525_v4 = vld [vmem:[%s710_s1 + $0x10] ss:$8 sps:$4 sm:$0xff]   ;;  %v526_v5 = vld [vmem:[%s710_s1 + $0x24] ss:$8 sps:$4 sm:$0xff]   ;;  %v528_v6 = vld [vmem:[%s710_s1 + $0x20] ss:$8 sps:$4 sm:$0xff]  }
   0x3   :  { %93 = vmatpush1.bf16.msra.mxu0 %v522_v2  ;;  %v529_v7 = vld [vmem:[%s710_s1 + $0x34] ss:$8 sps:$4 sm:$0xff]   ;;  %v532_v8 = vld [vmem:[%s711_s3 + $0x40] sm:$0xff]   ;;  %v534_v10 = vld [vmem:[%s711_s3 + $0x48] sm:$0xff]   ;;  %v39_v34 = vshrl.u32 %v38_v33, 7  ;;  %vm558_vm1 = vmmov 0  }
   0x4   :  { %94 = vmatprep.subr.bf16.mxu0 %v523_v3  ;;  %v533_v9 = vld [vmem:[%s711_s3] sm:$0xff]   ;;  %466 = vmatprep.subr.bf16.mxu1 %v532_v8  ;;  %v535_v11 = vld [vmem:[%s711_s3 + $0x8] sm:$0xff]   ;;  %v536_v12 = vld [vmem:[%s711_s3 + $0x50] sm:$0xff]   ;;  %vm425_vm2 = vcmask 64512  }
   0x5   :  { %467 = vmatpush3.bf16.msra.mxu1 %v533_v9  ;;  %v531_v13 = vld [vmem:[%s710_s1 + $0x30] ss:$8 sps:$4 sm:$0xff]   ;;  %v27_v16 = vld [vmem:[%s712_s0] sm:$0xf]  ;;  %v542_v20 = vld [vmem:[%s711_s3 + $0x68] sm:$0xff]   ;;  %v40_v35 = vsub.s32 0, %v39_v34 }
   0x6   :  { %468 = vmatprep.subr.bf16.mxu1 %v534_v10  ;;  %v537_v14 = vld [vmem:[%s711_s3 + $0x10] sm:$0xff]   ;;  %v538_v15 = vld [vmem:[%s711_s3 + $0x58] sm:$0xff]   ;;  %v540_v18 = vld [vmem:[%s711_s3 + $0x60] sm:$0xff]   ;;  %v44_v37 = vsub.s32 1, %v39_v34 }
   0x7   :  { %95 = vmatpush1.bf16.msra.mxu0 %v525_v4  ;;  %v539_v17 = vld [vmem:[%s711_s3 + $0x18] sm:$0xff]   ;;  %v541_v19 = vld [vmem:[%s711_s3 + $0x20] sm:$0xff]   ;;  %v543_v21 = vld [vmem:[%s711_s3 + $0x28] sm:$0xff]  }
   0x8   :  { %96 = vmatprep.subr.bf16.mxu0 %v526_v5  ;;  %v544_v22 = vld [vmem:[%s711_s3 + $0x70] sm:$0xff]   ;;  %v546_v24 = vld [vmem:[%s711_s3 + $0x78] sm:$0xff]   ;;  %v548_v27 = vld [vmem:[%s713_s5] sm:$0xff]  }
   0x9   :  { %469 = vmatpush3.bf16.msra.mxu1 %v535_v11  ;;  %v545_v23 = vld [vmem:[%s711_s3 + $0x30] sm:$0xff]   ;;  %v547_v25 = vld [vmem:[%s711_s3 + $0x38] sm:$0xff]   ;;  %v549_v28 = vld [vmem:[%s713_s5 + $0x8] sm:$0xff]  }
   0xa   :  { %470 = vmatprep.subr.bf16.mxu1 %v536_v12  ;;  %v550_v29 = vld [vmem:[%s713_s5 + $0x10] sm:$0xff]   ;;  %v551_v30 = vld [vmem:[%s713_s5 + $0x18] sm:$0xff]   ;;  %v552_v31 = vld [vmem:[%s713_s5 + $0x20] sm:$0xff]  }
   0xb   :  { %97 = vmatpush1.bf16.msra.mxu0 %v528_v6  ;;  %v553_v32 = vld [vmem:[%s713_s5 + $0x28] sm:$0xff]   ;;  %v36_v36 = vld [vmem:[%s714_s2] sm:$0x3]  ;;  %v554_v50 = vld [vmem:[%s713_s5 + $0x30] sm:$0xff]  }
   0xc   :  { %98 = vmatprep.subr.bf16.mxu0 %v529_v7  ;;  %v41_v38 = vrot.slane %v36_v36, %v40_v35  ;;  %v45_v39 = vrot.slane %v36_v36, %v44_v37  ;;  %v555_v51 = vld [vmem:[%s713_s5 + $0x38] sm:$0xff]   ;;  %v440_v53 = vld [vmem:[%s715_s4] ss:$0 sm:$0xff] }
   0xd   :  { %471 = vmatpush3.bf16.msra.mxu1 %v537_v14  ;;  %v457_v61 = vld [vmem:[%s716_s6] ss:$0 sm:$0xff] }
   0xe   :  { %472 = vmatprep.subr.bf16.mxu1 %v538_v15 }
   0xf   :  { %99 = vmatpush1.bf16.msra.mxu0 %v531_v13 }
  0x10   :  { %497 = vmatprep.subr.bf16.mxu0 %v557_v26 }
  0x11   :  { %473 = vmatpush3.bf16.msra.mxu1 %v539_v17 }
  0x12   :  { %439 = vmatmul.mubr.msk.bf16.vlgmr.msra.gmra.mrb[0].mxu0 %vm88_vm0, %v27_v16  ;;  %474 = vmatprep.subr.bf16.mxu1 %v540_v18 }
  0x13   :  { %498 = vmatpush3.bf16.msra.mxu0 %v548_v27  ;;  %513 = vmatprep.mubr.msk.bf16.mxu0 %vm558_vm1, %v557_v26 }
  0x14   :  { %499 = vmatprep.subr.bf16.mxu0 %v557_v26 }
  0x15   :  { %475 = vmatpush3.bf16.msra.mxu1 %v541_v19 }
  0x16   :  { %476 = vmatprep.subr.bf16.mxu1 %v542_v20 }
  0x17   :  { %500 = vmatpush3.bf16.msra.mxu0 %v549_v28 }
  0x18   :  { %501 = vmatprep.subr.bf16.mxu0 %v557_v26 }
  0x19   :  { %477 = vmatpush3.bf16.msra.mxu1 %v543_v21 }
  0x1a   :  { %478 = vmatprep.subr.bf16.mxu1 %v544_v22 }
  0x1b   :  { %502 = vmatpush3.bf16.msra.mxu0 %v550_v29 }
  0x1c   :  { %503 = vmatprep.subr.bf16.mxu0 %v557_v26 }
  0x1d   :  { %479 = vmatpush3.bf16.msra.mxu1 %v545_v23 }
  0x1e   :  { %480 = vmatprep.subr.bf16.mxu1 %v546_v24 }
  0x1f   :  { %504 = vmatpush3.bf16.msra.mxu0 %v551_v30 }
  0x20   :  { %505 = vmatprep.subr.bf16.mxu0 %v557_v26 }
  0x21   :  { %481 = vmatpush3.bf16.msra.mxu1 %v547_v25 }
  0x23   :  { %506 = vmatpush3.bf16.msra.mxu0 %v552_v31 }
  0x24   :  { %507 = vmatprep.subr.bf16.mxu0 %v557_v26 }
  0x27   :  { %508 = vmatpush3.bf16.msra.mxu0 %v553_v32 }
  0x28   :  { %509 = vmatprep.subr.bf16.mxu0 %v557_v26 }
  0x2b   :  { %510 = vmatpush3.bf16.msra.mxu0 %v554_v50 }
  0x2c   :  { %511 = vmatprep.subr.bf16.mxu0 %v557_v26 }
  0x2f   :  { %512 = vmatpush3.bf16.msra.mxu0 %v555_v51 }
  0xe5   :  { %v126_v40 = vpop.f32.mrb[0].mxu0 }
  0xe6   :  { %v127_v41 = vadd.f32 %v126_v40, %v41_v38  ;;  %v128_v42 = vpop.f32.mrb[1].mxu0 }
  0xe7   :  { %v129_v43 = vadd.f32 %v128_v42, %v45_v39  ;;  %v130_v44 = vpop.f32.mrb[2].mxu0 }
  0xe8   :  { %v133_v45 = vmax.f32 %v127_v41, 0.0  ;;  %v131_v46 = vpop.f32.mrb[3].mxu0 }
  0xe9   :  { %v134_v47 = vmax.f32 %v129_v43, 0.0 }
  0xea   :  { %v135_v49 = vpack.c.bf16 %v133_v45, %v133_v45 }
  0xeb   :  { %v136_v48 = vpack.c.bf16 %v134_v47, %v134_v47 }
  0xed   :  { %304 = vmatprep.mubr.bf16.mxu1 %v136_v48 }
  0xee   :  { %305 = vmatmul.mubr.bf16.vlgmr.msra.gmra.mrb[0].mxu1 %v135_v49 }
 0x1c1   :  { %v482_v52 = vpop.f32.mrb[0].mxu1 }
 0x1c2   :  { %v483_v54 = vpop.f32.mrb[1].mxu1 }
 0x1c3   :  { %v484_v55 = vadd.f32 %v483_v54, %v482_v52  ;;  %v485_v56 = vpop.f32.mrb[2].mxu1 }
 0x1c4   :  { %v486_v57 = vpop.f32.mrb[3].mxu1 }
 0x1c5   :  { %v307_v58 = vadd.f32 %v484_v55, %v440_v53 }
 0x1c7   :  { %v312_v59 = vmax.f32 %v307_v58, 0.0 }
 0x1c9   :  { %v313_v60 = vpack.c.bf16 %v312_v59, %v312_v59 }
 0x1cb   :  { %514 = vmatmul.mubr.bf16.vlgmr.msra.gmra.mrb[4].mxu0 %v313_v60 }
 0x29e   :  { %v419_v62 = vpop.f32.mrb[4].mxu0 }
 0x29f   :  { %v420_v63 = vadd.f32 %v457_v61, %v419_v62  ;;  %v515_v0 = vpop.f32.mrb[5].mxu0 }
 0x2a0   :  { %v422_v1 = vpop.f32.mrb[6].mxu0 }
 0x2a1   :  { %426 = vst.msk [vmem:[%s717_s7] sm:$0xff] %vm425_vm2, %v420_v63  ;;  %v516_v2 = vpop.f32.mrb[7].mxu0 }

</bundles_post_ra>
